<compile_context>
chip_gen: v5e
topology: v5e:2x2
jax: 0.10.0
libtpu: 0.0.40
codegen_flags: <defaults>
</compile_context>

<pallas_src>
import functools

import jax
import jax.numpy as jnp
from jax import lax
from jax.experimental import pallas as pl
from jax.experimental.pallas import tpu as pltpu

RRELU_SLOPE = (1.0 / 8.0 + 1.0 / 3.0) / 2.0  # 11/48, F.rrelu eval-mode slope


def _rrelu(v):
    # Valid because 0 < slope < 1: mul+max (2 VALU ops) instead of
    # cmp+mul+select (3 VALU ops).
    return jnp.maximum(v, v * RRELU_SLOPE)


def _round_up(a, m):
    return (a + m - 1) // m * m


def mlp2_kernel(x_ref, w1_ref, b1_ref, w2_ref, b2_ref, w3_ref, b3_ref, o_ref):
    """Fused 3-layer MLP on one batch tile.

    x_ref is the natural (bt, d_in) input tile.  Every intermediate is kept
    transposed (features on sublanes, batch on lanes) so the final d_out=1
    result is a lane-dense (1, bt) store.
    """
    x_blk = x_ref[...].astype(w1_ref.dtype)              # (bt, d_in) compute dtype

    # Layer 1: contract d_in of W1 (h1, d_in) with d_in of x (bt, d_in)
    # -> (h1, bt), f32 accumulation on the MXU.
    h1 = lax.dot_general(
        w1_ref[...], x_blk,
        dimension_numbers=(((1,), (1,)), ((), ())),
        preferred_element_type=jnp.float32,
    )
    h1 = _rrelu(h1 + b1_ref[...])                        # (h1, bt) f32
    h1 = h1.astype(w2_ref.dtype)

    # Layer 2: (h2, h1) @ (h1, bt) -> (h2, bt), f32 accumulation on the MXU.
    h2 = jnp.dot(w2_ref[...], h1, preferred_element_type=jnp.float32)
    h2 = _rrelu(h2 + b2_ref[...])                        # (h2, bt) f32

    # Layer 3 (single output unit): broadcast-mul + sublane reduce on VPU/XLU
    # instead of a serialized 1-output-row MXU pass.
    y = jnp.sum(w3_ref[...] * h2, axis=0, keepdims=True) + b3_ref[...]
    o_ref[...] = _rrelu(y).astype(o_ref.dtype)           # lane-dense (1, bt)


@functools.partial(jax.jit, static_argnames=("batch_tile", "compute_dtype"))
def mlp2_forward(x, w1, b1, w2, b2, w3, b3, *, batch_tile=8192,
                 compute_dtype=jnp.bfloat16):
    """Forward pass of MLP_2Layers (rrelu in eval mode).

    x : (B, d_in)                               (PyTorch input layout)
    w1: (h1, d_in)  b1: (h1,)                   (PyTorch nn.Linear layout)
    w2: (h2, h1)    b2: (h2,)
    w3: (1,  h2)    b3: (1,)
    returns (B, 1) in x.dtype.
    """
    B, d_in = x.shape
    h1n = w1.shape[0]
    h2n = w2.shape[0]
    d_out = w3.shape[0]
    assert d_out == 1, "MLP_2Layers output layer has a single unit"

    x_itemsize = jnp.dtype(x.dtype).itemsize
    c_itemsize = jnp.dtype(compute_dtype).itemsize

    # --- Batch-tile sizing: as large as a modest VMEM budget allows ---------
    # Per-column VMEM that scales with bt: double-buffered x tile, in-kernel
    # compute-dtype copy of x, f32 + compute-dtype h1/h2 intermediates, and
    # the double-buffered f32 output tile.
    per_col = (2 * d_in * x_itemsize
               + d_in * c_itemsize
               + (h1n + h2n) * (4 + c_itemsize)
               + 2 * 4)
    tile_budget = 12 * 1024 * 1024
    bt = min(batch_tile, max(128, tile_budget // per_col))
    B_ceil = _round_up(B, 128)
    if B_ceil >= 256:
        # Keep >= 2 grid steps so both v7x TensorCores get work
        # (no-op on single-TC v5e/v6e).
        bt = min(bt, _round_up(-(-B_ceil // 2), 128))
    bt = _round_up(min(bt, B_ceil), 128)

    grid_n = pl.cdiv(B, bt)
    B_out = grid_n * bt            # lane-dense output slab width (sliced later)

    # --- Wrapper-side prep: weights/biases only (tiny, one-time) ------------
    # x is passed through untouched: no pad / transpose / cast pass over it.
    w1c = w1.astype(compute_dtype)
    w2c = w2.astype(compute_dtype)
    b1c = b1.astype(jnp.float32).reshape(h1n, 1)
    b2c = b2.astype(jnp.float32).reshape(h2n, 1)
    w3c = w3.astype(jnp.float32).reshape(h2n, 1)   # column for VPU/XLU layer 3
    b3c = b3.astype(jnp.float32).reshape(1, 1)

    # --- Advisory cost + VMEM budget computed from the actual footprint -----
    flops = 2 * B * (d_in * h1n + h1n * h2n + h2n * d_out)
    bytes_accessed = (
        B * d_in * x_itemsize                         # streamed x (f32, natural)
        + B_out * d_out * 4                           # output slab (f32)
        + (w1c.size + w2c.size) * c_itemsize          # resident weights
        + (h1n + h2n + h2n + 1) * 4                   # biases + w3 column
    )

    resident = 2 * ((w1c.size + w2c.size) * c_itemsize       # dbl-buffered by
                    + (h1n + h2n + h2n + 1) * 4)             # default
    streamed = bt * (2 * d_in * x_itemsize + 2 * 4)           # x + out tiles
    temps = 2 * bt * (d_in * c_itemsize + (h1n + h2n) * (4 + c_itemsize))
    vmem_limit = resident + streamed + temps + (4 << 20)      # + headroom
    vmem_limit = int(max(16 << 20, min(vmem_limit, 56 << 20)))  # v7x-safe cap

    out2d = pl.pallas_call(
        mlp2_kernel,
        out_shape=jax.ShapeDtypeStruct((1, B_out), jnp.float32),
        grid_spec=pltpu.PrefetchScalarGridSpec(
            num_scalar_prefetch=0,
            grid=(grid_n,),
            in_specs=[
                # x tile in natural (batch, d_in) layout; last (partial) block
                # is masked by Pallas boundary handling — garbage batch rows
                # only affect padded output columns, which are sliced off.
                pl.BlockSpec((bt, d_in), lambda i: (i, 0)),
                # Weights / biases: full arrays, constant index map -> resident.
                pl.BlockSpec((h1n, d_in), lambda i: (0, 0)),
                pl.BlockSpec((h1n, 1), lambda i: (0, 0)),
                pl.BlockSpec((h2n, h1n), lambda i: (0, 0)),
                pl.BlockSpec((h2n, 1), lambda i: (0, 0)),
                pl.BlockSpec((h2n, 1), lambda i: (0, 0)),   # w3 as a column
                pl.BlockSpec((1, 1), lambda i: (0, 0)),
            ],
            # Lane-dense output row: (1, bt) block of the (1, B_out) slab.
            out_specs=pl.BlockSpec((1, bt), lambda i: (0, i)),
        ),
        compiler_params=pltpu.CompilerParams(
            dimension_semantics=("parallel",),
            vmem_limit_bytes=vmem_limit,
        ),
        cost_estimate=pl.CostEstimate(
            flops=int(flops), transcendentals=0,
            bytes_accessed=int(bytes_accessed),
        ),
    )(x, w1c, b1c, w2c, b2c, w3c, b3c)

    # Back to PyTorch layout: (B, 1), original dtype, padded columns dropped.
    return out2d[0, :B].reshape(B, 1).astype(x.dtype)


def init_linear(key, fan_in, fan_out, dtype=jnp.float32):
    """PyTorch-style nn.Linear init: U(-1/sqrt(fan_in), 1/sqrt(fan_in)).
    Returns W with PyTorch shape (fan_out, fan_in) and b with shape (fan_out,)."""
    kw, kb = jax.random.split(key)
    bound = 1.0 / jnp.sqrt(fan_in)
    w = jax.random.uniform(kw, (fan_out, fan_in), dtype, -bound, bound)
    b = jax.random.uniform(kb, (fan_out,), dtype, -bound, bound)
    return w, b


def reference_forward(x, w1, b1, w2, b2, w3, b3):
    """Pure-JAX f32 reference of the PyTorch forward (rrelu in eval mode)."""
    h = _rrelu(x @ w1.T + b1)
    h = _rrelu(h @ w2.T + b2)
    return _rrelu(h @ w3.T + b3)


if __name__ == "__main__":
    # Small shapes consistent with MLP_2Layers(input_size, h1_num, h2_num)
    batch = 8
    input_size = 16
    h1_num = 32
    h2_num = 32

    root = jax.random.PRNGKey(0)
    kx, k1, k2, k3, kx2 = jax.random.split(root, 5)

    x = jax.random.normal(kx, (batch, input_size), jnp.float32)
    w1, b1 = init_linear(k1, input_size, h1_num)
    w2, b2 = init_linear(k2, h1_num, h2_num)
    w3, b3 = init_linear(k3, h2_num, 1)

    out = mlp2_forward(x, w1, b1, w2, b2, w3, b3)
    out = jax.block_until_ready(out)

    ref = reference_forward(x, w1, b1, w2, b2, w3, b3)
    assert out.shape == (batch, 1)
    # bf16 weights with f32 accumulation -> loosened tolerance vs f32 ref.
    assert jnp.allclose(out, ref, atol=5e-2, rtol=5e-2), "mismatch vs reference"

    # Second check: batch not a multiple of the tile (exercises the partial
    # boundary block and a multi-step grid).
    batch2 = 300
    x2 = jax.random.normal(kx2, (batch2, input_size), jnp.float32)
    out2 = jax.block_until_ready(mlp2_forward(x2, w1, b1, w2, b2, w3, b3))
    ref2 = reference_forward(x2, w1, b1, w2, b2, w3, b3)
    assert out2.shape == (batch2, 1)
    assert jnp.allclose(out2, ref2, atol=5e-2, rtol=5e-2), "mismatch (batch=300)"

    print("KERNEL_OK")
</pallas_src>

<mosaic_0001>
module attributes {stable_mosaic.version = 11 : i64} {
  func.func @mlp2_kernel(%arg0: i32, %arg1: memref<128x16xf32, #tpu.memory_space<vmem>>, %arg2: memref<32x16xbf16, #tpu.memory_space<vmem>>, %arg3: memref<32x1xf32, #tpu.memory_space<vmem>>, %arg4: memref<32x32xbf16, #tpu.memory_space<vmem>>, %arg5: memref<32x1xf32, #tpu.memory_space<vmem>>, %arg6: memref<32x1xf32, #tpu.memory_space<vmem>>, %arg7: memref<1x1xf32, #tpu.memory_space<vmem>>, %arg8: memref<1x128xf32, #tpu.memory_space<vmem>>) attributes {dimension_semantics = [#tpu.dimension_semantics<parallel>], iteration_bounds = array<i64: 1>, scalar_prefetch = 0 : i64, scratch_operands = 0 : i64, tpu.core_type = #tpu.core_type<tc>, window_params = [{transform_indices = @transform_0, window_bounds = array<i64: 128, 16>}, {pipeline_mode = #tpu.pipeline_mode<synchronous>, transform_indices = @transform_1, window_bounds = array<i64: 32, 16>}, {pipeline_mode = #tpu.pipeline_mode<synchronous>, transform_indices = @transform_2, window_bounds = array<i64: 32, 1>}, {pipeline_mode = #tpu.pipeline_mode<synchronous>, transform_indices = @transform_3, window_bounds = array<i64: 32, 32>}, {pipeline_mode = #tpu.pipeline_mode<synchronous>, transform_indices = @transform_4, window_bounds = array<i64: 32, 1>}, {pipeline_mode = #tpu.pipeline_mode<synchronous>, transform_indices = @transform_5, window_bounds = array<i64: 32, 1>}, {pipeline_mode = #tpu.pipeline_mode<synchronous>, transform_indices = @transform_6, window_bounds = array<i64: 1, 1>}, {transform_indices = @transform_7, window_bounds = array<i64: 1, 128>}]} {
    %c0 = arith.constant 0 : index
    %c0_0 = arith.constant 0 : index
    %0 = vector.load %arg1[%c0, %c0_0] : memref<128x16xf32, #tpu.memory_space<vmem>>, vector<128x16xf32>
    %1 = arith.truncf %0 : vector<128x16xf32> to vector<128x16xbf16>
    %c0_1 = arith.constant 0 : index
    %c0_2 = arith.constant 0 : index
    %2 = vector.load %arg2[%c0_1, %c0_2] : memref<32x16xbf16, #tpu.memory_space<vmem>>, vector<32x16xbf16>
    %cst = arith.constant dense<0.000000e+00> : vector<32x128xf32>
    %3 = tpu.matmul %2, %1, %cst {dimension_numbers = #tpu.dot_dimension_numbers<[1], [1], [0], [0], [0, 0, 1, 0], [], []>} : vector<32x16xbf16>, vector<128x16xbf16>, vector<32x128xf32> -> vector<32x128xf32>
    %c0_3 = arith.constant 0 : index
    %c0_4 = arith.constant 0 : index
    %4 = vector.load %arg3[%c0_3, %c0_4] : memref<32x1xf32, #tpu.memory_space<vmem>>, vector<32x1xf32>
    %5 = vector.broadcast %4 : vector<32x1xf32> to vector<32x128xf32>
    %6 = arith.addf %3, %5 : vector<32x128xf32>
    %cst_5 = arith.constant 0.229166672 : f32
    %7 = vector.broadcast %cst_5 : f32 to vector<32x128xf32>
    %8 = arith.mulf %6, %7 : vector<32x128xf32>
    %9 = arith.maximumf %6, %8 : vector<32x128xf32>
    %10 = arith.truncf %9 : vector<32x128xf32> to vector<32x128xbf16>
    %c0_6 = arith.constant 0 : index
    %c0_7 = arith.constant 0 : index
    %11 = vector.load %arg4[%c0_6, %c0_7] : memref<32x32xbf16, #tpu.memory_space<vmem>>, vector<32x32xbf16>
    %cst_8 = arith.constant dense<0.000000e+00> : vector<32x128xf32>
    %12 = tpu.matmul %11, %10, %cst_8 {dimension_numbers = #tpu.dot_dimension_numbers<[1], [0], [0], [1], [0, 0, 1, 1], [], []>} : vector<32x32xbf16>, vector<32x128xbf16>, vector<32x128xf32> -> vector<32x128xf32>
    %c0_9 = arith.constant 0 : index
    %c0_10 = arith.constant 0 : index
    %13 = vector.load %arg5[%c0_9, %c0_10] : memref<32x1xf32, #tpu.memory_space<vmem>>, vector<32x1xf32>
    %14 = vector.broadcast %13 : vector<32x1xf32> to vector<32x128xf32>
    %15 = arith.addf %12, %14 : vector<32x128xf32>
    %cst_11 = arith.constant 0.229166672 : f32
    %16 = vector.broadcast %cst_11 : f32 to vector<32x128xf32>
    %17 = arith.mulf %15, %16 : vector<32x128xf32>
    %18 = arith.maximumf %15, %17 : vector<32x128xf32>
    %c0_12 = arith.constant 0 : index
    %c0_13 = arith.constant 0 : index
    %19 = vector.load %arg6[%c0_12, %c0_13] : memref<32x1xf32, #tpu.memory_space<vmem>>, vector<32x1xf32>
    %20 = vector.broadcast %19 : vector<32x1xf32> to vector<32x128xf32>
    %21 = arith.mulf %20, %18 : vector<32x128xf32>
    %cst_14 = arith.constant dense<0.000000e+00> : vector<128xf32>
    %22 = vector.multi_reduction <add>, %21, %cst_14 [0] : vector<32x128xf32> to vector<128xf32>
    %23 = vector.shape_cast %22 : vector<128xf32> to vector<1x128xf32>
    %c0_15 = arith.constant 0 : index
    %c0_16 = arith.constant 0 : index
    %24 = vector.load %arg7[%c0_15, %c0_16] : memref<1x1xf32, #tpu.memory_space<vmem>>, vector<1x1xf32>
    %25 = vector.broadcast %24 : vector<1x1xf32> to vector<1x128xf32>
    %26 = arith.addf %23, %25 : vector<1x128xf32>
    %cst_17 = arith.constant 0.229166672 : f32
    %27 = vector.broadcast %cst_17 : f32 to vector<1x128xf32>
    %28 = arith.mulf %26, %27 : vector<1x128xf32>
    %29 = arith.maximumf %26, %28 : vector<1x128xf32>
    %c0_18 = arith.constant 0 : index
    %c0_19 = arith.constant 0 : index
    %30 = vector.load %arg8[%c0_18, %c0_19] : memref<1x128xf32, #tpu.memory_space<vmem>>, vector<1x128xf32>
    tpu.vector_store %arg8[%c0_18, %c0_19], %29 {strides = array<i32>} : memref<1x128xf32, #tpu.memory_space<vmem>>, vector<1x128xf32>,
    return
  }
  func.func @transform_0(%arg0: i32) -> (i32, i32) {
    %c0_i32 = arith.constant 0 : i32
    %c0_i32_0 = arith.constant 0 : i32
    return %arg0, %c0_i32 : i32, i32
  }
  func.func @transform_1(%arg0: i32) -> (i32, i32) {
    %c0_i32 = arith.constant 0 : i32
    %c0_i32_0 = arith.constant 0 : i32
    %c0_i32_1 = arith.constant 0 : i32
    return %c0_i32, %c0_i32_0 : i32, i32
  }
  func.func @transform_2(%arg0: i32) -> (i32, i32) {
    %c0_i32 = arith.constant 0 : i32
    %c0_i32_0 = arith.constant 0 : i32
    %c0_i32_1 = arith.constant 0 : i32
    return %c0_i32, %c0_i32_0 : i32, i32
  }
  func.func @transform_3(%arg0: i32) -> (i32, i32) {
    %c0_i32 = arith.constant 0 : i32
    %c0_i32_0 = arith.constant 0 : i32
    %c0_i32_1 = arith.constant 0 : i32
    return %c0_i32, %c0_i32_0 : i32, i32
  }
  func.func @transform_4(%arg0: i32) -> (i32, i32) {
    %c0_i32 = arith.constant 0 : i32
    %c0_i32_0 = arith.constant 0 : i32
    %c0_i32_1 = arith.constant 0 : i32
    return %c0_i32, %c0_i32_0 : i32, i32
  }
  func.func @transform_5(%arg0: i32) -> (i32, i32) {
    %c0_i32 = arith.constant 0 : i32
    %c0_i32_0 = arith.constant 0 : i32
    %c0_i32_1 = arith.constant 0 : i32
    return %c0_i32, %c0_i32_0 : i32, i32
  }
  func.func @transform_6(%arg0: i32) -> (i32, i32) {
    %c0_i32 = arith.constant 0 : i32
    %c0_i32_0 = arith.constant 0 : i32
    %c0_i32_1 = arith.constant 0 : i32
    return %c0_i32, %c0_i32_0 : i32, i32
  }
  func.func @transform_7(%arg0: i32) -> (i32, i32) {
    %c0_i32 = arith.constant 0 : i32
    %c0_i32_0 = arith.constant 0 : i32
    return %c0_i32, %arg0 : i32, i32
  }
}

</mosaic_0001>

<bundles_post_ra>
// kernel: mlp2_forward.1
= control target key start
LH: loop header
LB: loop body
LE: loop exit
PB: predicated region body
PF: predicated region fallthrough
CT: control target
= control target key end

     0   :  { %vm91_vm0 = vcmask 130048   ;;  %v311_v12 = vmov 0   ;;  %vm189_vm1 = vcmask 261120   ;;  %s464_s0 = inlined_call_operand.vmem [shape: f32[8,16], index: 0, kind: input, shape index: {}]   ;;  %s465_s2 = inlined_call_operand.vmem [shape: f32[32,1], index: 2, kind: input, shape index: {}]   ;;  %s466_s4 = inlined_call_operand.vmem [shape: f32[32,1], index: 4, kind: input, shape index: {}]   ;;  %s467_s6 = inlined_call_operand.<no memory space> [shape: f32[1,1], index: 6, kind: input, shape index: {}]   ;;  %s468_s5 = inlined_call_operand.vmem [shape: f32[32,1], index: 5, kind: input, shape index: {}]   ;;  %s469_s1 = inlined_call_operand.vmem [shape: bf16[32,16], index: 1, kind: input, shape index: {}]   ;;  %s470_s3 = inlined_call_operand.vmem [shape: bf16[32,32], index: 3, kind: input, shape index: {}]   ;;  %s471_s7 = inlined_call_operand.vmem [shape: f32[1,128], index: 7, kind: output, shape index: {}]  }
   0x1   :  { %v43_v0 = vld [vmem:[%s464_s0 + $0x70] sm:$0xff]  ;;  %v44_v1 = vld [vmem:[%s464_s0 + $0x78] sm:$0xff]  ;;  %v41_v3 = vld [vmem:[%s464_s0 + $0x60] sm:$0xff]  ;;  %308 = vset.pattern.permute.xlu0 %v311_v12  ;;  %309 = vset.pattern.permute.xlu1 %v311_v12  ;;  %v12_v28 = vstv %s467_s6 }
   0x2   :  { %v52_v2 = vpack.c.bf16 %v44_v1, %v43_v0  ;;  %v42_v4 = vld [vmem:[%s464_s0 + $0x68] sm:$0xff]  ;;  %v39_v8 = vld [vmem:[%s464_s0 + $0x50] sm:$0xff]  ;;  %v40_v9 = vld [vmem:[%s464_s0 + $0x58] sm:$0xff]  ;;  %310 = vset.pattern.permute.xlu2 %v311_v12  ;;  %13 = vst [vmem:[#allocation2] sm:$0x1] %v12_v28 }
   0x3   :  { %v51_v6 = vpack.c.bf16 %v42_v4, %v41_v3  ;;  %v59_v10 = vld [vmem:[%s465_s2 + $0x10] sm:$0xff]  ;;  %v50_v11 = vpack.c.bf16 %v40_v9, %v39_v8  ;;  %v37_v14 = vld [vmem:[%s464_s0 + $0x40] sm:$0xff]  ;;  %v38_v15 = vld [vmem:[%s464_s0 + $0x48] sm:$0xff] }
   0x4   :  { %v120_v5 = vsel %vm91_vm0, %v52_v2, 0  ;;  %73 = vperm.xlu0 %308, %v59_v10   ;;  %v60_v16 = vld [vmem:[%s465_s2 + $0x18] sm:$0xff]  ;;  %v49_v17 = vpack.c.bf16 %v38_v15, %v37_v14  ;;  %v35_v19 = vld [vmem:[%s464_s0 + $0x30] sm:$0xff]  ;;  %v57_v21 = vld [vmem:[%s465_s2] sm:$0xff] }
   0x5   :  { %122 = vmatpush.bf16.xpose.msra.mxu0 %v120_v5  ;;  %299 = vmatpush.bf16.xpose.msra.mxu2 %v120_v5  ;;  %v117_v7 = vsel %vm91_vm0, %v51_v6, 0  ;;  %v114_v13 = vsel %vm91_vm0, %v50_v11, 0  ;;  %v36_v20 = vld [vmem:[%s464_s0 + $0x38] sm:$0xff]  ;;  %v33_v24 = vld [vmem:[%s464_s0 + $0x20] sm:$0xff]  ;;  %v34_v25 = vld [vmem:[%s464_s0 + $0x28] sm:$0xff] }
   0x6   :  { %v111_v18 = vsel %vm91_vm0, %v49_v17, 0  ;;  %v48_v22 = vpack.c.bf16 %v36_v20, %v35_v19  ;;  %63 = vperm.xlu1 %309, %v57_v21   ;;  %v157_v26 = vld [vmem:[%s466_s4 + $0x10] sm:$0xff]  ;;  %v58_v27 = vld [vmem:[%s465_s2 + $0x8] sm:$0xff]  ;;  %v47_v29 = vpack.c.bf16 %v34_v25, %v33_v24  ;;  %v32_v32 = vld [vmem:[%s464_s0 + $0x18] sm:$0xff] }
   0x7   :  { %v31_v31 = vld [vmem:[%s464_s0 + $0x10] sm:$0xff]  ;;  %v224_v33 = vld [vmem:[%s468_s5 + $0x8] sm:$0xff]  ;;  %v158_v34 = vld [vmem:[%s466_s4 + $0x18] sm:$0xff] }
   0x8   :  { %v108_v23 = vsel %vm91_vm0, %v48_v22, 0  ;;  %v105_v30 = vsel %vm91_vm0, %v47_v29, 0  ;;  %v46_v35 = vpack.c.bf16 %v32_v32, %v31_v31  ;;  %v29_v37 = vld [vmem:[%s464_s0] sm:$0xff]  ;;  %v30_v38 = vld [vmem:[%s464_s0 + $0x8] sm:$0xff]  ;;  %v225_v40 = vld [vmem:[%s468_s5 + $0x10] sm:$0xff] }
   0x9   :  { %v260_v39 = vld [vmem:[#allocation2] sm:$0x1]  ;;  %v45_v41 = vpack.c.bf16 %v30_v38, %v29_v37  ;;  %v296_v44 = vld [vmem:[%s469_s1 + $0x8] sm:$0xff] }
   0xa   :  { %v102_v36 = vsel %vm91_vm0, %v46_v35, 0  ;;  %v295_v43 = vld [vmem:[%s469_s1] sm:$0xff]  ;;  %v156_v0 = vld [vmem:[%s466_s4 + $0x8] sm:$0xff] }
   0xb   :  { %v99_v42 = vsel %vm91_vm0, %v45_v41, 0  ;;  %v155_v56 = vld [vmem:[%s466_s4] sm:$0xff]  ;;  %v298_v8 = vld [vmem:[%s470_s3 + $0x8] sm:$0xff] }
   0xc   :  { %78 = vperm.xlu0 %308, %v60_v16   ;;  %161 = vperm.xlu2 %310, %v155_v56   ;;  %v297_v5 = vld [vmem:[%s470_s3] sm:$0xff] }
   0xd   :  { %123 = vmatpush.bf16.xpose.msra.mxu0 %v117_v7  ;;  %300 = vmatpush.bf16.xpose.msra.mxu2 %v117_v7  ;;  %v223_v6 = vld [vmem:[%s468_s5] sm:$0xff]  ;;  %v226_v7 = vld [vmem:[%s468_s5 + $0x18] sm:$0xff] }
   0xe   :  { %68 = vperm.xlu1 %309, %v58_v27  }
  0x14   :  { %171 = vperm.xlu0 %308, %v157_v26   ;;  %166 = vperm.xlu2 %310, %v156_v0  }
  0x15   :  { %124 = vmatpush.bf16.xpose.msra.mxu0 %v114_v13  ;;  %301 = vmatpush.bf16.xpose.msra.mxu2 %v114_v13 }
  0x16   :  { %176 = vperm.xlu1 %309, %v158_v34  }
  0x1c   :  { %234 = vperm.xlu0 %308, %v224_v33   ;;  %229 = vperm.xlu2 %310, %v223_v6  }
  0x1d   :  { %125 = vmatpush.bf16.xpose.msra.mxu0 %v111_v18  ;;  %302 = vmatpush.bf16.xpose.msra.mxu2 %v111_v18 }
  0x1e   :  { %239 = vperm.xlu1 %309, %v225_v40  }
  0x24   :  { %263 = vperm.xlu0 %308, %v260_v39   ;;  %244 = vperm.xlu2 %310, %v226_v7  }
  0x25   :  { %126 = vmatpush.bf16.xpose.msra.mxu0 %v108_v23  ;;  %303 = vmatpush.bf16.xpose.msra.mxu2 %v108_v23 }
  0x2d   :  { %127 = vmatpush.bf16.xpose.msra.mxu0 %v105_v30  ;;  %304 = vmatpush.bf16.xpose.msra.mxu2 %v105_v30 }
  0x35   :  { %128 = vmatpush.bf16.xpose.msra.mxu0 %v102_v36  ;;  %305 = vmatpush.bf16.xpose.msra.mxu2 %v102_v36 }
  0x3d   :  { %129 = vmatpush.bf16.xpose.msra.mxu0 %v99_v42  ;;  %306 = vmatpush.bf16.xpose.msra.mxu2 %v99_v42 }
  0x44   :  { %283 = vmatmul.msk.bf16.vlgmr.msra.gmra.mxu0 %vm91_vm0, %v295_v43  ;;  %284 = vmatmul.msk.bf16.vlgmr.msra.gmra.mxu2 %vm91_vm0, %v296_v44 }
  0x66   :  { %v162_v9 = vpop.permute.xlu2 %161 }
  0x6e   :  { %v167_v12 = vpop.permute.xlu2 %166 }
  0x76   :  { %v74_v47 = vpop.permute.xlu0 %73  ;;  %v230_v22 = vpop.permute.xlu2 %229 }
  0x78   :  { %v64_v46 = vpop.permute.xlu1 %63 }
  0x7e   :  { %v79_v54 = vpop.permute.xlu0 %78  ;;  %v245_v36 = vpop.permute.xlu2 %244 }
  0x80   :  { %v69_v51 = vpop.permute.xlu1 %68 }
  0x86   :  { %v172_v14 = vpop.permute.xlu0 %171 }
  0x88   :  { %v177_v16 = vpop.permute.xlu1 %176 }
  0x8e   :  { %v235_v26 = vpop.permute.xlu0 %234 }
  0x90   :  { %v240_v30 = vpop.permute.xlu1 %239 }
  0x96   :  { %v264_v44 = vpop.permute.xlu0 %263 }
  0xc1   :  { %v131_v45 = vpop.f32.mrf.mxu0 }
  0xc2   :  { %v132_v52 = vadd.f32 %v131_v45, %v64_v46  ;;  %v266_v46 = vperm.slane %v264_v44, 0 }
  0xc4   :  { %v141_v59 = vmul.f32 0.22916667, %v132_v52 }
  0xc6   :  { %v145_v1 = vmax.f32 %v132_v52, %v141_v59 }
  0xc7   :  { %v136_v48 = vpop.f32.mrf.mxu2 }
  0xc8   :  { %v137_v50 = vadd.f32 %v136_v48, %v74_v47 }
  0xc9   :  { %v133_v49 = vpop.f32.mrf.mxu0 }
  0xca   :  { %v134_v53 = vadd.f32 %v133_v49, %v69_v51  ;;  %v143_v57 = vmul.f32 0.22916667, %v137_v50 }
  0xcc   :  { %v142_v60 = vmul.f32 0.22916667, %v134_v53  ;;  %v147_v62 = vmax.f32 %v137_v50, %v143_v57 }
  0xce   :  { %v146_v2 = vmax.f32 %v134_v53, %v142_v60 }
  0xcf   :  { %v138_v55 = vpop.f32.mrf.mxu2 }
  0xd0   :  { %v139_v58 = vadd.f32 %v138_v55, %v79_v54  ;;  %v149_v4 = vpack.c.bf16 %v146_v2, %v145_v1 }
  0xd2   :  { %v144_v61 = vmul.f32 0.22916667, %v139_v58 }
  0xd4   :  { %v148_v63 = vmax.f32 %v139_v58, %v144_v61 }
  0xd6   :  { %v150_v3 = vpack.c.bf16 %v148_v63, %v147_v62 }
  0xd8   :  { %202 = vmatpush.bf16.msra.mxu1 %v150_v3 }
  0xdc   :  { %203 = vmatpush.bf16.msra.mxu1 %v149_v4 }
  0xdf   :  { %293 = vmatmul.msk.bf16.vlgmr.msra.gmra.mxu1 %vm189_vm1, %v297_v5 }
  0xef   :  { %294 = vmatmul.msk.bf16.gmra.mxu1 %vm189_vm1, %v298_v8 }
 0x15c   :  { %v205_v10 = vpop.f32.mrf.mxu1 }
 0x15d   :  { %v206_v15 = vadd.f32 %v205_v10, %v162_v9 }
 0x15f   :  { %v215_v20 = vmul.f32 0.22916667, %v206_v15 }
 0x161   :  { %v219_v24 = vmax.f32 %v206_v15, %v215_v20 }
 0x163   :  { %v247_v31 = vmul.f32 %v230_v22, %v219_v24 }
 0x164   :  { %v207_v11 = vpop.f32.mrf.mxu1 }
 0x165   :  { %v208_v13 = vadd.f32 %v207_v11, %v167_v12 }
 0x167   :  { %v216_v18 = vmul.f32 0.22916667, %v208_v13 }
 0x169   :  { %v220_v23 = vmax.f32 %v208_v13, %v216_v18 }
 0x16b   :  { %v248_v28 = vmul.f32 %v235_v26, %v220_v23 }
 0x16c   :  { %v210_v17 = vpop.f32.mrf.mxu1 }
 0x16d   :  { %v211_v19 = vadd.f32 %v210_v17, %v172_v14  ;;  %v251_v34 = vadd.f32 %v248_v28, %v247_v31 }
 0x16f   :  { %v217_v21 = vmul.f32 0.22916667, %v211_v19 }
 0x171   :  { %v221_v25 = vmax.f32 %v211_v19, %v217_v21 }
 0x173   :  { %v249_v32 = vmul.f32 %v240_v30, %v221_v25 }
 0x174   :  { %v212_v27 = vpop.f32.mrf.mxu1 }
 0x175   :  { %v213_v29 = vadd.f32 %v212_v27, %v177_v16  ;;  %v252_v37 = vadd.f32 %v251_v34, %v249_v32 }
 0x177   :  { %v218_v33 = vmul.f32 0.22916667, %v213_v29 }
 0x179   :  { %v222_v35 = vmax.f32 %v213_v29, %v218_v33 }
 0x17b   :  { %v250_v38 = vmul.f32 %v245_v36, %v222_v35 }
 0x17d   :  { %v253_v39 = vadd.f32 %v252_v37, %v250_v38 }
 0x17f   :  { %v254_v40 = vrot.slane %v253_v39, 4 }
 0x181   :  { %v255_v41 = vadd.f32 %v254_v40, %v253_v39 }
 0x183   :  { %v256_v42 = vrot.slane %v255_v41, 2 }
 0x185   :  { %v257_v43 = vadd.f32 %v256_v42, %v255_v41 }
 0x187   :  { %v258_v45 = vrot.slane %v257_v43, 1 }
 0x189   :  { %v259_v47 = vadd.f32 %v258_v45, %v257_v43 }
 0x18b   :  { %v267_v48 = vadd.f32 %v266_v46, %v259_v47 }
 0x18d   :  { %v268_v49 = vmul.f32 0.22916667, %v267_v48 }
 0x18f   :  { %v269_v50 = vmax.f32 %v267_v48, %v268_v49 }
 0x191   :  { %270 = vst [vmem:[%s471_s7] sm:$0x1] %v269_v50 }

</bundles_post_ra>
